<compile_context>
chip_gen: v7x
topology: tpu7x:2x2x1
jax: 0.10.0
libtpu: 0.0.40
codegen_flags: <defaults>
</compile_context>

<pallas_src>
import jax
import jax.numpy as jnp
from jax.experimental import pallas as pl
from jax.experimental.pallas import tpu as pltpu

N_DOMAINS = 14
IN_DIM = N_DOMAINS * 3    # 42
HID_DIM = 100
OUT_DIM = N_DOMAINS       # 14

HID_PAD = 128             # lane-dense hidden width (zero-padded)


def predictor_kernel(x_ref, w1_ref, b1_ref, w2_ref, b2_ref, o_ref):
    # First linear: bf16 MXU matmul, f32 accumulate, f32 bias add.
    x = x_ref[...].astype(jnp.bfloat16)
    h = jnp.dot(x, w1_ref[...], preferred_element_type=jnp.float32) + b1_ref[...]
    # Sigmoid via one EUP tanh (sigmoid(x) = 0.5*tanh(x/2) + 0.5), kept in f32.
    h = 0.5 * jnp.tanh(0.5 * h) + 0.5
    # Second linear: bf16 MXU matmul, f32 accumulate, f32 bias add.
    out = jnp.dot(h.astype(jnp.bfloat16), w2_ref[...],
                  preferred_element_type=jnp.float32) + b2_ref[...]
    o_ref[...] = out.astype(o_ref.dtype)     # (tb, 14) store, hidden under DMA


def prepare_params(w1, b1, w2, b2):
    """One-time parameter prep: pad hidden dim to 128 lanes, cast weights to bf16.

    Zero-padded w1 columns + zero b1 entries give h==0 on padded hidden units;
    sigmoid(0)=0.5 is then multiplied by zero-padded w2 rows, so padding is
    semantically exact.  Cache the returned tuple; do NOT rebuild per call.
    """
    w1_p = jnp.zeros((IN_DIM, HID_PAD), jnp.bfloat16).at[:, :HID_DIM].set(
        w1.astype(jnp.bfloat16))
    b1_p = jnp.zeros((1, HID_PAD), jnp.float32).at[:, :HID_DIM].set(
        b1.astype(jnp.float32)[None, :])
    w2_p = jnp.zeros((HID_PAD, OUT_DIM), jnp.bfloat16).at[:HID_DIM, :].set(
        w2.astype(jnp.bfloat16))
    b2_p = b2.astype(jnp.float32)[None, :]                       # (1, 14)
    return w1_p, b1_p, w2_p, b2_p


def predictor_forward(x, prepared_params, *, tb=4096):
    """x: (B, 42) f32; prepared_params from prepare_params(). Returns (B, 14)."""
    w1_p, b1_p, w2_p, b2_p = prepared_params
    B = x.shape[0]
    dtype = x.dtype

    # Batch tiling: keep >=2 grid steps when the batch is big enough to split
    # (v7x megacore shards the "parallel" axis only across multiple steps).
    if B <= tb:
        if B >= 16:
            tb_eff = pl.cdiv(pl.cdiv(B, 2), 8) * 8   # ~half batch, sublane-aligned
        else:
            tb_eff = B                               # single tile == full array
    else:
        tb_eff = tb
    b_pad = pl.cdiv(B, tb_eff) * tb_eff
    x_p = x if b_pad == B else jnp.pad(x, ((0, b_pad - B), (0, 0)))

    cost = pl.CostEstimate(
        flops=2 * b_pad * (IN_DIM * HID_PAD + HID_PAD * OUT_DIM),
        transcendentals=b_pad * HID_DIM,
        bytes_accessed=(b_pad * IN_DIM + b_pad * OUT_DIM) * 4
                       + (IN_DIM * HID_PAD + HID_PAD * OUT_DIM) * 2
                       + (HID_PAD + OUT_DIM) * 4,
    )

    out = pl.pallas_call(
        predictor_kernel,
        out_shape=jax.ShapeDtypeStruct((b_pad, OUT_DIM), dtype),
        grid_spec=pl.GridSpec(
            grid=(b_pad // tb_eff,),
            in_specs=[
                pl.BlockSpec((tb_eff, IN_DIM), lambda i: (i, 0)),    # x tile
                pl.BlockSpec((IN_DIM, HID_PAD), lambda i: (0, 0)),   # w1 (resident)
                pl.BlockSpec((1, HID_PAD), lambda i: (0, 0)),        # b1 (resident)
                pl.BlockSpec((HID_PAD, OUT_DIM), lambda i: (0, 0)),  # w2 (resident)
                pl.BlockSpec((1, OUT_DIM), lambda i: (0, 0)),        # b2 (resident)
            ],
            out_specs=pl.BlockSpec((tb_eff, OUT_DIM), lambda i: (i, 0)),
        ),
        compiler_params=pltpu.CompilerParams(
            dimension_semantics=("parallel",),
            vmem_limit_bytes=48 << 20),
        cost_estimate=cost,
    )(x_p, w1_p, b1_p, w2_p, b2_p)

    return out if b_pad == B else out[:B]


def init_params(key):
    """PyTorch-style default Linear init: uniform(-1/sqrt(fan_in), 1/sqrt(fan_in)).
    Weights kept in math layout (in, out) (transpose of torch's (out, in))."""
    k1, k2, k3, k4 = jax.random.split(key, 4)
    bound1 = 1.0 / jnp.sqrt(IN_DIM)
    bound2 = 1.0 / jnp.sqrt(HID_DIM)
    w1 = jax.random.uniform(k1, (IN_DIM, HID_DIM), jnp.float32, -bound1, bound1)
    b1 = jax.random.uniform(k2, (HID_DIM,), jnp.float32, -bound1, bound1)
    w2 = jax.random.uniform(k3, (HID_DIM, OUT_DIM), jnp.float32, -bound2, bound2)
    b2 = jax.random.uniform(k4, (OUT_DIM,), jnp.float32, -bound2, bound2)
    return w1, b1, w2, b2


if __name__ == "__main__":
    key = jax.random.PRNGKey(0)
    kx, kp = jax.random.split(key)
    w1, b1, w2, b2 = init_params(kp)
    params = prepare_params(w1, b1, w2, b2)   # one-time, out of the hot path

    def ref_fn(x):
        return jax.nn.sigmoid(x @ w1 + b1) @ w2 + b2

    # Small demo batch: single grid step (tb_eff == B == 8).
    batch = 8
    x = jax.random.normal(kx, (batch, IN_DIM), dtype=jnp.float32)
    out = jax.block_until_ready(predictor_forward(x, params))
    assert out.shape == (batch, OUT_DIM)
    assert jnp.allclose(out, ref_fn(x), atol=1e-2, rtol=1e-2)

    # Moderate batch, default tiling: auto-split into >=2 steps (megacore path),
    # ragged batch padded to the tile and sliced back.
    batch2 = 20
    x2 = jax.random.normal(kx, (batch2, IN_DIM), dtype=jnp.float32)
    out2 = jax.block_until_ready(predictor_forward(x2, params))
    assert out2.shape == (batch2, OUT_DIM)
    assert jnp.allclose(out2, ref_fn(x2), atol=1e-2, rtol=1e-2)

    # Explicit small tile: exercises a >2-step pipelined grid.
    out3 = jax.block_until_ready(predictor_forward(x2, params, tb=8))
    assert out3.shape == (batch2, OUT_DIM)
    assert jnp.allclose(out3, ref_fn(x2), atol=1e-2, rtol=1e-2)

    print("KERNEL_OK")
</pallas_src>

<mosaic_0001>
module attributes {stable_mosaic.version = 11 : i64} {
  func.func @predictor_kernel(%arg0: i32, %arg1: memref<8x42xf32, #tpu.memory_space<vmem>>, %arg2: memref<42x128xbf16, #tpu.memory_space<vmem>>, %arg3: memref<1x128xf32, #tpu.memory_space<vmem>>, %arg4: memref<128x14xbf16, #tpu.memory_space<vmem>>, %arg5: memref<1x14xf32, #tpu.memory_space<vmem>>, %arg6: memref<8x14xf32, #tpu.memory_space<vmem>>) attributes {dimension_semantics = [#tpu.dimension_semantics<parallel>], iteration_bounds = array<i64: 1>, scalar_prefetch = 0 : i64, scratch_operands = 0 : i64, tpu.core_type = #tpu.core_type<tc>, window_params = [{transform_indices = @transform_0, window_bounds = array<i64: 8, 42>}, {pipeline_mode = #tpu.pipeline_mode<synchronous>, transform_indices = @transform_1, window_bounds = array<i64: 42, 128>}, {pipeline_mode = #tpu.pipeline_mode<synchronous>, transform_indices = @transform_2, window_bounds = array<i64: 1, 128>}, {pipeline_mode = #tpu.pipeline_mode<synchronous>, transform_indices = @transform_3, window_bounds = array<i64: 128, 14>}, {pipeline_mode = #tpu.pipeline_mode<synchronous>, transform_indices = @transform_4, window_bounds = array<i64: 1, 14>}, {transform_indices = @transform_5, window_bounds = array<i64: 8, 14>}]} {
    %c0 = arith.constant 0 : index
    %c0_0 = arith.constant 0 : index
    %0 = vector.load %arg1[%c0, %c0_0] : memref<8x42xf32, #tpu.memory_space<vmem>>, vector<8x42xf32>
    %1 = arith.truncf %0 : vector<8x42xf32> to vector<8x42xbf16>
    %c0_1 = arith.constant 0 : index
    %c0_2 = arith.constant 0 : index
    %2 = vector.load %arg2[%c0_1, %c0_2] : memref<42x128xbf16, #tpu.memory_space<vmem>>, vector<42x128xbf16>
    %cst = arith.constant dense<0.000000e+00> : vector<8x128xf32>
    %3 = tpu.matmul %1, %2, %cst {dimension_numbers = #tpu.dot_dimension_numbers<[1], [0], [0], [1], [0, 0, 1, 1], [], []>} : vector<8x42xbf16>, vector<42x128xbf16>, vector<8x128xf32> -> vector<8x128xf32>
    %c0_3 = arith.constant 0 : index
    %c0_4 = arith.constant 0 : index
    %4 = vector.load %arg3[%c0_3, %c0_4] : memref<1x128xf32, #tpu.memory_space<vmem>>, vector<1x128xf32>
    %5 = vector.broadcast %4 : vector<1x128xf32> to vector<8x128xf32>
    %6 = arith.addf %3, %5 : vector<8x128xf32>
    %cst_5 = arith.constant 5.000000e-01 : f32
    %7 = vector.broadcast %cst_5 : f32 to vector<8x128xf32>
    %8 = arith.mulf %7, %6 : vector<8x128xf32>
    %9 = math.tanh %8 : vector<8x128xf32>
    %cst_6 = arith.constant 5.000000e-01 : f32
    %10 = vector.broadcast %cst_6 : f32 to vector<8x128xf32>
    %11 = arith.mulf %10, %9 : vector<8x128xf32>
    %cst_7 = arith.constant 5.000000e-01 : f32
    %12 = vector.broadcast %cst_7 : f32 to vector<8x128xf32>
    %13 = arith.addf %11, %12 : vector<8x128xf32>
    %14 = arith.truncf %13 : vector<8x128xf32> to vector<8x128xbf16>
    %c0_8 = arith.constant 0 : index
    %c0_9 = arith.constant 0 : index
    %15 = vector.load %arg4[%c0_8, %c0_9] : memref<128x14xbf16, #tpu.memory_space<vmem>>, vector<128x14xbf16>
    %cst_10 = arith.constant dense<0.000000e+00> : vector<8x14xf32>
    %16 = tpu.matmul %14, %15, %cst_10 {dimension_numbers = #tpu.dot_dimension_numbers<[1], [0], [0], [1], [0, 0, 1, 1], [], []>} : vector<8x128xbf16>, vector<128x14xbf16>, vector<8x14xf32> -> vector<8x14xf32>
    %c0_11 = arith.constant 0 : index
    %c0_12 = arith.constant 0 : index
    %17 = vector.load %arg5[%c0_11, %c0_12] : memref<1x14xf32, #tpu.memory_space<vmem>>, vector<1x14xf32>
    %18 = vector.broadcast %17 : vector<1x14xf32> to vector<8x14xf32>
    %19 = arith.addf %16, %18 : vector<8x14xf32>
    %c0_13 = arith.constant 0 : index
    %c0_14 = arith.constant 0 : index
    %20 = vector.load %arg6[%c0_13, %c0_14] : memref<8x14xf32, #tpu.memory_space<vmem>>, vector<8x14xf32>
    tpu.vector_store %arg6[%c0_13, %c0_14], %19 {strides = array<i32>} : memref<8x14xf32, #tpu.memory_space<vmem>>, vector<8x14xf32>,
    return
  }
  func.func @transform_0(%arg0: i32) -> (i32, i32) {
    %c0_i32 = arith.constant 0 : i32
    %c0_i32_0 = arith.constant 0 : i32
    return %arg0, %c0_i32 : i32, i32
  }
  func.func @transform_1(%arg0: i32) -> (i32, i32) {
    %c0_i32 = arith.constant 0 : i32
    %c0_i32_0 = arith.constant 0 : i32
    %c0_i32_1 = arith.constant 0 : i32
    return %c0_i32, %c0_i32_0 : i32, i32
  }
  func.func @transform_2(%arg0: i32) -> (i32, i32) {
    %c0_i32 = arith.constant 0 : i32
    %c0_i32_0 = arith.constant 0 : i32
    %c0_i32_1 = arith.constant 0 : i32
    return %c0_i32, %c0_i32_0 : i32, i32
  }
  func.func @transform_3(%arg0: i32) -> (i32, i32) {
    %c0_i32 = arith.constant 0 : i32
    %c0_i32_0 = arith.constant 0 : i32
    %c0_i32_1 = arith.constant 0 : i32
    return %c0_i32, %c0_i32_0 : i32, i32
  }
  func.func @transform_4(%arg0: i32) -> (i32, i32) {
    %c0_i32 = arith.constant 0 : i32
    %c0_i32_0 = arith.constant 0 : i32
    %c0_i32_1 = arith.constant 0 : i32
    return %c0_i32, %c0_i32_0 : i32, i32
  }
  func.func @transform_5(%arg0: i32) -> (i32, i32) {
    %c0_i32 = arith.constant 0 : i32
    %c0_i32_0 = arith.constant 0 : i32
    return %arg0, %c0_i32 : i32, i32
  }
}

</mosaic_0001>

<bundles_post_ra>
// kernel: tpu_custom_call.1
= control target key start
LH: loop header
LB: loop body
LE: loop exit
PB: predicated region body
PF: predicated region fallthrough
CT: control target
= control target key end

     0   :  { %v331_v1 = vmov 0.0   ;;  %vm58_vm0 = vcmask 1044480   ;;  %vm332_vm1 = vmmov 0   ;;  %vm54_vm2 = vcmask 343040   ;;  %s418_s0 = inlined_call_operand.vmem [shape: f32[8,42], index: 0, kind: input, shape index: {}]   ;;  %s419_s1 = inlined_call_operand.vmem [shape: bf16[42,128], index: 1, kind: input, shape index: {}]   ;;  %s420_s2 = inlined_call_operand.vmem [shape: f32[1,128], index: 2, kind: input, shape index: {}]   ;;  %s421_s3 = inlined_call_operand.vmem [shape: bf16[128,14], index: 3, kind: input, shape index: {}]   ;;  %s422_s4 = inlined_call_operand.vmem [shape: f32[1,14], index: 4, kind: input, shape index: {}]   ;;  %s423_s5 = inlined_call_operand.hbm [shape: f32[8,14], index: 5, kind: output, shape index: {}]  }
   0x1   :  { %v294_v0 = vld [vmem:[%s419_s1] sm:$0xff]   ;;  %261 = vmatprep.subr.bf16.mxu0 %v331_v1  ;;  %v295_v2 = vld [vmem:[%s419_s1 + $0x8] sm:$0xff]   ;;  %271 = vmatprep.subr.bf16.mxu1 %v331_v1  ;;  %v296_v3 = vld [vmem:[%s419_s1 + $0x10] sm:$0x1f]  }
   0x2   :  { %262 = vmatpush3.bf16.msra.mxu0 %v294_v0  ;;  %v297_v4 = vld [vmem:[%s421_s3] sm:$0xff]   ;;  %267 = vmatprep.mubr.msk.bf16.mxu0 %vm332_vm1, %v331_v1  ;;  %v298_v5 = vld [vmem:[%s421_s3 + $0x8] sm:$0xff]   ;;  %v60_v6 = vsel %vm58_vm0, %v296_v3, 0  ;;  %v299_v8 = vld [vmem:[%s421_s3 + $0x10] sm:$0xff]  }
   0x3   :  { %263 = vmatprep.subr.bf16.mxu0 %v331_v1  ;;  %287 = vmatprep.mubr.msk.bf16.mxu1 %vm332_vm1, %v331_v1  ;;  %v22_v7 = vld [vmem:[%s418_s0] sm:$0xff] }
   0x4   :  { %272 = vmatpush3.bf16.msra.mxu1 %v297_v4  ;;  %v23_v9 = vpack.c.bf16 %v22_v7, %v22_v7 }
   0x5   :  { %273 = vmatprep.subr.bf16.mxu1 %v331_v1 }
   0x6   :  { %264 = vmatpush3.bf16.msra.mxu0 %v295_v2 }
   0x7   :  { %265 = vmatprep.subr.bf16.mxu0 %v331_v1 }
   0x8   :  { %274 = vmatpush3.bf16.msra.mxu1 %v298_v5 }
   0x9   :  { %275 = vmatprep.subr.bf16.mxu1 %v331_v1 }
   0xa   :  { %266 = vmatpush3.bf16.msra.mxu0 %v60_v6 }
   0xb   :  { %10 = vsyncpa [#allocation3], 0  ;;  %v300_v10 = vld [vmem:[%s421_s3 + $0x18] sm:$0xff]   ;;  %v301_v11 = vld [vmem:[%s421_s3 + $0x20] sm:$0xff]   ;;  %vm218_vm3 = vcmask 113664  }
   0xc   :  { %276 = vmatpush3.bf16.msra.mxu1 %v299_v8  ;;  %v302_v12 = vld [vmem:[%s421_s3 + $0x28] sm:$0xff]   ;;  %v303_v13 = vld [vmem:[%s421_s3 + $0x30] sm:$0xff]   ;;  %v304_v14 = vld [vmem:[%s421_s3 + $0x38] sm:$0xff]   ;;  %s333_s3 = smov [#allocation2]  }
   0xd   :  { %268 = vmatmul.mubr.msk.bf16.vlgmr.msra.gmra.mrb[0].mxu0 %vm54_vm2, %v23_v9  ;;  %277 = vmatprep.subr.bf16.mxu1 %v331_v1  ;;  %v234_v15 = vld [vmem:[%s420_s2] ss:$0 sm:$0xff]  ;;  %s226_s19 = sshll.u32 %s333_s3, 4  ;;  %s227_s19 = int_to_ptr.vmem [resolvable:$true] %s226_s19 }
   0xe   :  { %v239_v26 = vld [vmem:[%s422_s4] ss:$0 sm:$0xff]  ;;  %s307_s2 = scalar_lea.vmem %s227_s19, 128  ;;  %p312_p1 = scmp.lt.s32.totalorder %s227_s19, %s227_s19 }
   0xf   :  { %p308_p0 = scmp.ne.s32.totalorder %s227_s19, %s307_s2  ;;  %p313_p2 = scmp.lt.s32.totalorder %s307_s2, %s307_s2 }
  0x10   :  { %278 = vmatpush3.bf16.msra.mxu1 %v300_v10 }
  0x11   :  { %279 = vmatprep.subr.bf16.mxu1 %v331_v1  ;;  %p314_p3 = por %p313_p2, %p312_p1 }
  0x13   :  { %p315_p4 = pnand %p314_p3, %p308_p0 }
  0x14   :  { %280 = vmatpush3.bf16.msra.mxu1 %v301_v11 }
  0x15   :  { %281 = vmatprep.subr.bf16.mxu1 %v331_v1 }
  0x18   :  { %282 = vmatpush3.bf16.msra.mxu1 %v302_v12 }
  0x19   :  { %283 = vmatprep.subr.bf16.mxu1 %v331_v1 }
  0x1c   :  { %284 = vmatpush3.bf16.msra.mxu1 %v303_v13 }
  0x1d   :  { %285 = vmatprep.subr.bf16.mxu1 %v331_v1 }
  0x20   :  { %286 = vmatpush3.bf16.msra.mxu1 %v304_v14 }
  0xe0   :  { %v96_v16 = vpop.f32.mrb[0].mxu0 }
  0xe1   :  { %v97_v17 = vadd.f32 %v234_v15, %v96_v16  ;;  %v269_v18 = vpop.f32.mrb[1].mxu0 }
  0xe2   :  { %v99_v19 = vpop.f32.mrb[2].mxu0 }
  0xe3   :  { %v102_v20 = vmul.f32 0.5, %v97_v17  ;;  %v270_v21 = vpop.f32.mrb[3].mxu0 }
  0xe5   :  { %305 = vtanh.f32 %v102_v20 }
  0xef   :  { %v306_v22 = vpop.eup %305 }
  0xf0   :  { %v104_v23 = vmul.f32 0.5, %v306_v22 }
  0xf2   :  { %v105_v24 = vadd.f32 0.5, %v104_v23 }
  0xf4   :  { %v106_v25 = vpack.c.bf16 %v105_v24, %v105_v24 }
  0xf6   :  { %288 = vmatmul.mubr.bf16.vlgmr.msra.gmra.mrb[0].mxu1 %v106_v25 }
 0x1c9   :  { %v212_v27 = vpop.f32.mrb[0].mxu1 }
 0x1ca   :  { %v213_v28 = vadd.f32 %v239_v26, %v212_v27  ;;  %v289_v29 = vpop.f32.mrb[1].mxu1 }
 0x1cb   :  { %v215_v30 = vpop.f32.mrb[2].mxu1 }
 0x1cc   :  { %v290_v31 = vpop.f32.mrb[3].mxu1  ;;  %219 = vst.msk [vmem:[#allocation2] sm:$0xff] %vm218_vm3, %v213_v28 }
 0x1cd   :  { %318 = shalt.err (!%p315_p4)
}
 0x1ce   :  { %s319_s4 = scalar_lea.hbm %s423_s5, 128 }
 0x1cf   :  { %p320_p5 = scmp.ne.s32.totalorder %s423_s5, %s319_s4  ;;  %p323_p6 = scmp.lt.u32.totalorder %s319_s4, %s423_s5 }
 0x1d1   :  { %p325_p7 = pnand %p323_p6, %p320_p5 }
 0x1d3   :  { %328 = shalt.err (!%p325_p7)
}
 0x1d4   :  { %229 = dma.vmem_to_hbm [thread:$0]  %s227_s19, 128, %s423_s5, [#allocation3]  }
 0x1d5   :  { %329 = dma.done.wait [#allocation3], 128  }
 0x1d6   :  { %330 = vsyncadd [#allocation3], 4294967168 }
 0x1d7   :  { %233 = vsyncpa [#allocation3], 1 }

</bundles_post_ra>
